<compile_context>
chip_gen: v5e
topology: v5e:2x2
jax: 0.10.0
libtpu: 0.0.40
codegen_flags: <defaults>
</compile_context>

<pallas_src>
import functools

import jax
import jax.numpy as jnp
from jax.experimental import pallas as pl
from jax.experimental.pallas import tpu as pltpu

LN_EPS = 1e-5      # PyTorch nn.LayerNorm default
SUBLANE = 8


def _round_up(n, m):
    return ((n + m - 1) // m) * m


# ---------------------------------------------------------------------------
# Kernel
# ---------------------------------------------------------------------------
def _actor_kernel(x_ref,
                  w1_ref, b1_ref, g1_ref, be1_ref,
                  w2_ref, b2_ref, g2_ref, be2_ref,
                  w3_ref, b3_ref,
                  out_ref,
                  *, max_action):
    """One batch tile: 3 matmuls + 2 fused LayerNorm/ReLU + tanh.

    Matmul inputs may be bf16 (MXU-native); accumulation (preferred_element_type)
    and the whole LayerNorm / ReLU chain are f32.  LayerNorm variance is the
    exact two-pass form (feature dims are unpadded, so jnp.mean is exact).
    """
    compute_dtype = w1_ref.dtype  # bf16 when use_bf16, else f32

    def layernorm_relu(h, g, be):
        mu = jnp.mean(h, axis=-1, keepdims=True)
        hm = h - mu
        var = jnp.mean(hm * hm, axis=-1, keepdims=True)
        h = hm * jax.lax.rsqrt(var + LN_EPS) * g + be
        return jnp.maximum(h, 0.0)

    x = x_ref[...]

    # ---- fc1 + LayerNorm + ReLU -------------------------------------------
    h = jnp.dot(x, w1_ref[...], preferred_element_type=jnp.float32) + b1_ref[...]
    h = layernorm_relu(h, g1_ref[...], be1_ref[...])

    # ---- fc2 + LayerNorm + ReLU -------------------------------------------
    h = jnp.dot(h.astype(compute_dtype), w2_ref[...],
                preferred_element_type=jnp.float32) + b2_ref[...]
    h = layernorm_relu(h, g2_ref[...], be2_ref[...])

    # ---- fc_policy + tanh ---------------------------------------------------
    p = jnp.dot(h.astype(compute_dtype), w3_ref[...],
                preferred_element_type=jnp.float32) + b3_ref[...]
    out_ref[...] = (max_action * jnp.tanh(p)).astype(out_ref.dtype)


# ---------------------------------------------------------------------------
# Wrapper: batch grid, VMEM-resident weights, optional bf16 MXU inputs
# ---------------------------------------------------------------------------
def actor_forward(x, params, max_action=1.0, tile_b=1024, use_bf16=True):
    """x: [B, state_dim] float32 -> pi: [B, action_space] float32."""
    (w1, b1, g1, be1, w2, b2, g2, be2, w3, b3) = params
    batch, state_dim = x.shape
    f1 = w1.shape[1]
    f2 = w2.shape[1]
    action_space = w3.shape[1]

    mxu_dtype = jnp.bfloat16 if use_bf16 else jnp.float32

    # Adaptive batch tile: keep the tile a multiple of 8 and small enough that
    # the "parallel" grid has >= 2 steps whenever the batch allows it (v7x has
    # 2 TensorCores; this axis is the only thing sharding work across them).
    cap = _round_up(pl.cdiv(batch, 2), SUBLANE)
    tile_b = max(SUBLANE, min(_round_up(int(tile_b), SUBLANE), cap))
    bp = _round_up(batch, tile_b)
    nb = bp // tile_b

    # Only batch-dim padding (zeros); feature dims keep their true widths.
    x_p = x.astype(mxu_dtype)
    if bp != batch:
        x_p = jnp.pad(x_p, ((0, bp - batch), (0, 0)))

    def f32(a):
        return a.astype(jnp.float32)

    w1c = w1.astype(mxu_dtype)
    w2c = w2.astype(mxu_dtype)
    w3c = w3.astype(mxu_dtype)
    b1c, g1c, be1c = f32(b1), f32(g1), f32(be1)
    b2c, g2c, be2c = f32(b2), f32(g2), f32(be2)
    b3c = f32(b3)

    kernel = functools.partial(_actor_kernel, max_action=float(max_action))

    def resident(shape):
        # Constant index_map -> same block every grid step -> stays VMEM-resident.
        return pl.BlockSpec(shape, lambda i: (0, 0))

    wbytes = 2 if use_bf16 else 4
    flops = 2 * bp * (state_dim * f1 + f1 * f2 + f2 * action_space)
    bytes_accessed = (bp * state_dim * wbytes + bp * action_space * 4
                      + (state_dim * f1 + f1 * f2 + f2 * action_space) * wbytes
                      + 4 * (3 * f1 + 3 * f2 + action_space))
    cost = pl.CostEstimate(flops=flops,
                           transcendentals=bp * (action_space + 2),
                           bytes_accessed=bytes_accessed)

    out_p = pl.pallas_call(
        kernel,
        out_shape=jax.ShapeDtypeStruct((bp, action_space), jnp.float32),
        grid=(nb,),
        in_specs=[
            pl.BlockSpec((tile_b, state_dim), lambda i: (i, 0)),     # x tile
            resident((state_dim, f1)), resident((1, f1)),            # W1, b1
            resident((1, f1)), resident((1, f1)),                    # g1, be1
            resident((f1, f2)), resident((1, f2)),                   # W2, b2
            resident((1, f2)), resident((1, f2)),                    # g2, be2
            resident((f2, action_space)), resident((1, action_space)),  # W3, b3
        ],
        out_specs=pl.BlockSpec((tile_b, action_space), lambda i: (i, 0)),
        compiler_params=pltpu.CompilerParams(
            dimension_semantics=("parallel",)),
        cost_estimate=cost,
    )(x_p, w1c, b1c, g1c, be1c, w2c, b2c, g2c, be2c, w3c, b3c)

    if bp != batch:
        out_p = out_p[:batch]
    return out_p


# ---------------------------------------------------------------------------
# Deterministic parameter initialization (mirrors the PyTorch __init__ intent:
# orthogonal(gain=sqrt(2)) for fc1/fc2, uniform(-1, 1) for fc_policy, zero
# biases, LayerNorm gamma=1 / beta=0).
# ---------------------------------------------------------------------------
def _orthogonal(key, in_dim, out_dim, gain):
    a = jax.random.normal(key, (max(in_dim, out_dim), min(in_dim, out_dim)),
                          dtype=jnp.float32)
    q, r = jnp.linalg.qr(a)
    q = q * jnp.sign(jnp.diagonal(r))
    if q.shape != (in_dim, out_dim):
        q = q.T
    q = q[:in_dim, :out_dim]
    return (gain * q).astype(jnp.float32)


def init_actor_params(key, state_dim, action_space, fc1_unit=64, fc2_unit=64,
                      init_weight_gain=jnp.sqrt(2.0),
                      init_policy_weight_gain=1.0, init_bias=0.0):
    k1, k2, k3 = jax.random.split(key, 3)
    w1 = _orthogonal(k1, state_dim, fc1_unit, init_weight_gain)      # [S, F1]
    w2 = _orthogonal(k2, fc1_unit, fc2_unit, init_weight_gain)       # [F1, F2]
    w3 = jax.random.uniform(k3, (fc2_unit, action_space),
                            minval=-init_policy_weight_gain,
                            maxval=init_policy_weight_gain,
                            dtype=jnp.float32)                       # [F2, A]
    b1 = jnp.full((1, fc1_unit), init_bias, jnp.float32)
    b2 = jnp.full((1, fc2_unit), init_bias, jnp.float32)
    b3 = jnp.full((1, action_space), init_bias, jnp.float32)
    g1 = jnp.ones((1, fc1_unit), jnp.float32)
    be1 = jnp.zeros((1, fc1_unit), jnp.float32)
    g2 = jnp.ones((1, fc2_unit), jnp.float32)
    be2 = jnp.zeros((1, fc2_unit), jnp.float32)
    return (w1, b1, g1, be1, w2, b2, g2, be2, w3, b3)


def _reference(x, params, max_action=1.0):
    (w1, b1, g1, be1, w2, b2, g2, be2, w3, b3) = params

    def ln(h, g, b):
        mu = jnp.mean(h, axis=-1, keepdims=True)
        var = jnp.mean((h - mu) ** 2, axis=-1, keepdims=True)
        return (h - mu) * jax.lax.rsqrt(var + LN_EPS) * g + b

    h = jax.nn.relu(ln(x @ w1 + b1, g1, be1))
    h = jax.nn.relu(ln(h @ w2 + b2, g2, be2))
    return max_action * jnp.tanh(h @ w3 + b3)


if __name__ == "__main__":
    state_dim, action_space = 16, 4
    max_action = 1.0

    key = jax.random.PRNGKey(0)
    kx, kp, kx2 = jax.random.split(key, 3)
    params = init_actor_params(kp, state_dim, action_space)

    # --- small case: batch=8, single grid step ------------------------------
    batch = 8
    x = jax.random.normal(kx, (batch, state_dim), dtype=jnp.float32)
    ref = _reference(x, params, max_action=max_action)

    # f32 path (bit-parity mode)
    pi_f32 = jax.block_until_ready(
        actor_forward(x, params, max_action=max_action, use_bf16=False))
    assert pi_f32.shape == (batch, action_space)
    assert jnp.allclose(pi_f32, ref, atol=1e-4, rtol=1e-4), \
        "mismatch vs reference (B=8, f32)"

    # bf16 MXU path (default, performance mode)
    pi_bf16 = jax.block_until_ready(
        actor_forward(x, params, max_action=max_action, use_bf16=True))
    assert pi_bf16.shape == (batch, action_space)
    assert jnp.allclose(pi_bf16, ref, atol=5e-2, rtol=5e-2), \
        "mismatch vs reference (B=8, bf16)"

    # --- multi-tile case: exercises the batch grid + batch padding ----------
    batch2 = 40
    x2 = jax.random.normal(kx2, (batch2, state_dim), dtype=jnp.float32)
    ref2 = _reference(x2, params, max_action=max_action)
    pi2 = jax.block_until_ready(
        actor_forward(x2, params, max_action=max_action, tile_b=16,
                      use_bf16=True))
    assert pi2.shape == (batch2, action_space)
    assert jnp.allclose(pi2, ref2, atol=5e-2, rtol=5e-2), \
        "mismatch vs reference (B=40, bf16, multi-tile)"

    pi2_f32 = jax.block_until_ready(
        actor_forward(x2, params, max_action=max_action, tile_b=16,
                      use_bf16=False))
    assert jnp.allclose(pi2_f32, ref2, atol=1e-4, rtol=1e-4), \
        "mismatch vs reference (B=40, f32, multi-tile)"

    print("KERNEL_OK")
</pallas_src>

<mosaic_0001>
module attributes {stable_mosaic.version = 11 : i64} {
  func.func @_actor_kernel(%arg0: i32, %arg1: memref<8x16xf32, #tpu.memory_space<vmem>>, %arg2: memref<16x64xf32, #tpu.memory_space<vmem>>, %arg3: memref<1x64xf32, #tpu.memory_space<vmem>>, %arg4: memref<1x64xf32, #tpu.memory_space<vmem>>, %arg5: memref<1x64xf32, #tpu.memory_space<vmem>>, %arg6: memref<64x64xf32, #tpu.memory_space<vmem>>, %arg7: memref<1x64xf32, #tpu.memory_space<vmem>>, %arg8: memref<1x64xf32, #tpu.memory_space<vmem>>, %arg9: memref<1x64xf32, #tpu.memory_space<vmem>>, %arg10: memref<64x4xf32, #tpu.memory_space<vmem>>, %arg11: memref<1x4xf32, #tpu.memory_space<vmem>>, %arg12: memref<8x4xf32, #tpu.memory_space<vmem>>) attributes {dimension_semantics = [#tpu.dimension_semantics<parallel>], iteration_bounds = array<i64: 1>, scalar_prefetch = 0 : i64, scratch_operands = 0 : i64, tpu.core_type = #tpu.core_type<tc>, window_params = [{transform_indices = @transform_0, window_bounds = array<i64: 8, 16>}, {pipeline_mode = #tpu.pipeline_mode<synchronous>, transform_indices = @transform_1, window_bounds = array<i64: 16, 64>}, {pipeline_mode = #tpu.pipeline_mode<synchronous>, transform_indices = @transform_2, window_bounds = array<i64: 1, 64>}, {pipeline_mode = #tpu.pipeline_mode<synchronous>, transform_indices = @transform_3, window_bounds = array<i64: 1, 64>}, {pipeline_mode = #tpu.pipeline_mode<synchronous>, transform_indices = @transform_4, window_bounds = array<i64: 1, 64>}, {pipeline_mode = #tpu.pipeline_mode<synchronous>, transform_indices = @transform_5, window_bounds = array<i64: 64, 64>}, {pipeline_mode = #tpu.pipeline_mode<synchronous>, transform_indices = @transform_6, window_bounds = array<i64: 1, 64>}, {pipeline_mode = #tpu.pipeline_mode<synchronous>, transform_indices = @transform_7, window_bounds = array<i64: 1, 64>}, {pipeline_mode = #tpu.pipeline_mode<synchronous>, transform_indices = @transform_8, window_bounds = array<i64: 1, 64>}, {pipeline_mode = #tpu.pipeline_mode<synchronous>, transform_indices = @transform_9, window_bounds = array<i64: 64, 4>}, {pipeline_mode = #tpu.pipeline_mode<synchronous>, transform_indices = @transform_10, window_bounds = array<i64: 1, 4>}, {transform_indices = @transform_11, window_bounds = array<i64: 8, 4>}]} {
    %c0 = arith.constant 0 : index
    %c0_0 = arith.constant 0 : index
    %0 = vector.load %arg1[%c0, %c0_0] : memref<8x16xf32, #tpu.memory_space<vmem>>, vector<8x16xf32>
    %c0_1 = arith.constant 0 : index
    %c0_2 = arith.constant 0 : index
    %1 = vector.load %arg2[%c0_1, %c0_2] : memref<16x64xf32, #tpu.memory_space<vmem>>, vector<16x64xf32>
    %cst = arith.constant dense<0.000000e+00> : vector<8x64xf32>
    %2 = tpu.matmul %0, %1, %cst {dimension_numbers = #tpu.dot_dimension_numbers<[1], [0], [0], [1], [0, 0, 1, 1], [], []>} : vector<8x16xf32>, vector<16x64xf32>, vector<8x64xf32> -> vector<8x64xf32>
    %c0_3 = arith.constant 0 : index
    %c0_4 = arith.constant 0 : index
    %3 = vector.load %arg3[%c0_3, %c0_4] : memref<1x64xf32, #tpu.memory_space<vmem>>, vector<1x64xf32>
    %4 = vector.broadcast %3 : vector<1x64xf32> to vector<8x64xf32>
    %5 = arith.addf %2, %4 : vector<8x64xf32>
    %c0_5 = arith.constant 0 : index
    %c0_6 = arith.constant 0 : index
    %6 = vector.load %arg4[%c0_5, %c0_6] : memref<1x64xf32, #tpu.memory_space<vmem>>, vector<1x64xf32>
    %c0_7 = arith.constant 0 : index
    %c0_8 = arith.constant 0 : index
    %7 = vector.load %arg5[%c0_7, %c0_8] : memref<1x64xf32, #tpu.memory_space<vmem>>, vector<1x64xf32>
    %cst_9 = arith.constant dense<0.000000e+00> : vector<8xf32>
    %8 = vector.multi_reduction <add>, %5, %cst_9 [1] : vector<8x64xf32> to vector<8xf32>
    %9 = vector.shape_cast %8 : vector<8xf32> to vector<8x1xf32>
    %cst_10 = arith.constant 6.400000e+01 : f32
    %10 = vector.broadcast %cst_10 : f32 to vector<8x1xf32>
    %11 = arith.divf %9, %10 : vector<8x1xf32>
    %12 = vector.broadcast %11 : vector<8x1xf32> to vector<8x64xf32>
    %13 = arith.subf %5, %12 : vector<8x64xf32>
    %14 = arith.mulf %13, %13 : vector<8x64xf32>
    %cst_11 = arith.constant dense<0.000000e+00> : vector<8xf32>
    %15 = vector.multi_reduction <add>, %14, %cst_11 [1] : vector<8x64xf32> to vector<8xf32>
    %16 = vector.shape_cast %15 : vector<8xf32> to vector<8x1xf32>
    %cst_12 = arith.constant 6.400000e+01 : f32
    %17 = vector.broadcast %cst_12 : f32 to vector<8x1xf32>
    %18 = arith.divf %16, %17 : vector<8x1xf32>
    %cst_13 = arith.constant 9.99999974E-6 : f32
    %19 = vector.broadcast %cst_13 : f32 to vector<8x1xf32>
    %20 = arith.addf %18, %19 : vector<8x1xf32>
    %21 = math.rsqrt %20 : vector<8x1xf32>
    %22 = vector.broadcast %21 : vector<8x1xf32> to vector<8x64xf32>
    %23 = arith.mulf %13, %22 : vector<8x64xf32>
    %24 = vector.broadcast %6 : vector<1x64xf32> to vector<8x64xf32>
    %25 = arith.mulf %23, %24 : vector<8x64xf32>
    %26 = vector.broadcast %7 : vector<1x64xf32> to vector<8x64xf32>
    %27 = arith.addf %25, %26 : vector<8x64xf32>
    %cst_14 = arith.constant 0.000000e+00 : f32
    %28 = vector.broadcast %cst_14 : f32 to vector<8x64xf32>
    %29 = arith.maximumf %27, %28 : vector<8x64xf32>
    %c0_15 = arith.constant 0 : index
    %c0_16 = arith.constant 0 : index
    %30 = vector.load %arg6[%c0_15, %c0_16] : memref<64x64xf32, #tpu.memory_space<vmem>>, vector<64x64xf32>
    %cst_17 = arith.constant dense<0.000000e+00> : vector<8x64xf32>
    %31 = tpu.matmul %29, %30, %cst_17 {dimension_numbers = #tpu.dot_dimension_numbers<[1], [0], [0], [1], [0, 0, 1, 1], [], []>} : vector<8x64xf32>, vector<64x64xf32>, vector<8x64xf32> -> vector<8x64xf32>
    %c0_18 = arith.constant 0 : index
    %c0_19 = arith.constant 0 : index
    %32 = vector.load %arg7[%c0_18, %c0_19] : memref<1x64xf32, #tpu.memory_space<vmem>>, vector<1x64xf32>
    %33 = vector.broadcast %32 : vector<1x64xf32> to vector<8x64xf32>
    %34 = arith.addf %31, %33 : vector<8x64xf32>
    %c0_20 = arith.constant 0 : index
    %c0_21 = arith.constant 0 : index
    %35 = vector.load %arg8[%c0_20, %c0_21] : memref<1x64xf32, #tpu.memory_space<vmem>>, vector<1x64xf32>
    %c0_22 = arith.constant 0 : index
    %c0_23 = arith.constant 0 : index
    %36 = vector.load %arg9[%c0_22, %c0_23] : memref<1x64xf32, #tpu.memory_space<vmem>>, vector<1x64xf32>
    %cst_24 = arith.constant dense<0.000000e+00> : vector<8xf32>
    %37 = vector.multi_reduction <add>, %34, %cst_24 [1] : vector<8x64xf32> to vector<8xf32>
    %38 = vector.shape_cast %37 : vector<8xf32> to vector<8x1xf32>
    %cst_25 = arith.constant 6.400000e+01 : f32
    %39 = vector.broadcast %cst_25 : f32 to vector<8x1xf32>
    %40 = arith.divf %38, %39 : vector<8x1xf32>
    %41 = vector.broadcast %40 : vector<8x1xf32> to vector<8x64xf32>
    %42 = arith.subf %34, %41 : vector<8x64xf32>
    %43 = arith.mulf %42, %42 : vector<8x64xf32>
    %cst_26 = arith.constant dense<0.000000e+00> : vector<8xf32>
    %44 = vector.multi_reduction <add>, %43, %cst_26 [1] : vector<8x64xf32> to vector<8xf32>
    %45 = vector.shape_cast %44 : vector<8xf32> to vector<8x1xf32>
    %cst_27 = arith.constant 6.400000e+01 : f32
    %46 = vector.broadcast %cst_27 : f32 to vector<8x1xf32>
    %47 = arith.divf %45, %46 : vector<8x1xf32>
    %cst_28 = arith.constant 9.99999974E-6 : f32
    %48 = vector.broadcast %cst_28 : f32 to vector<8x1xf32>
    %49 = arith.addf %47, %48 : vector<8x1xf32>
    %50 = math.rsqrt %49 : vector<8x1xf32>
    %51 = vector.broadcast %50 : vector<8x1xf32> to vector<8x64xf32>
    %52 = arith.mulf %42, %51 : vector<8x64xf32>
    %53 = vector.broadcast %35 : vector<1x64xf32> to vector<8x64xf32>
    %54 = arith.mulf %52, %53 : vector<8x64xf32>
    %55 = vector.broadcast %36 : vector<1x64xf32> to vector<8x64xf32>
    %56 = arith.addf %54, %55 : vector<8x64xf32>
    %cst_29 = arith.constant 0.000000e+00 : f32
    %57 = vector.broadcast %cst_29 : f32 to vector<8x64xf32>
    %58 = arith.maximumf %56, %57 : vector<8x64xf32>
    %c0_30 = arith.constant 0 : index
    %c0_31 = arith.constant 0 : index
    %59 = vector.load %arg10[%c0_30, %c0_31] : memref<64x4xf32, #tpu.memory_space<vmem>>, vector<64x4xf32>
    %cst_32 = arith.constant dense<0.000000e+00> : vector<8x4xf32>
    %60 = tpu.matmul %58, %59, %cst_32 {dimension_numbers = #tpu.dot_dimension_numbers<[1], [0], [0], [1], [0, 0, 1, 1], [], []>} : vector<8x64xf32>, vector<64x4xf32>, vector<8x4xf32> -> vector<8x4xf32>
    %c0_33 = arith.constant 0 : index
    %c0_34 = arith.constant 0 : index
    %61 = vector.load %arg11[%c0_33, %c0_34] : memref<1x4xf32, #tpu.memory_space<vmem>>, vector<1x4xf32>
    %62 = vector.broadcast %61 : vector<1x4xf32> to vector<8x4xf32>
    %63 = arith.addf %60, %62 : vector<8x4xf32>
    %64 = math.tanh %63 : vector<8x4xf32>
    %cst_35 = arith.constant 1.000000e+00 : f32
    %65 = vector.broadcast %cst_35 : f32 to vector<8x4xf32>
    %66 = arith.mulf %65, %64 : vector<8x4xf32>
    %c0_36 = arith.constant 0 : index
    %c0_37 = arith.constant 0 : index
    %67 = vector.load %arg12[%c0_36, %c0_37] : memref<8x4xf32, #tpu.memory_space<vmem>>, vector<8x4xf32>
    tpu.vector_store %arg12[%c0_36, %c0_37], %66 {strides = array<i32>} : memref<8x4xf32, #tpu.memory_space<vmem>>, vector<8x4xf32>,
    return
  }
  func.func @transform_0(%arg0: i32) -> (i32, i32) {
    %c0_i32 = arith.constant 0 : i32
    %c0_i32_0 = arith.constant 0 : i32
    return %arg0, %c0_i32 : i32, i32
  }
  func.func @transform_1(%arg0: i32) -> (i32, i32) {
    %c0_i32 = arith.constant 0 : i32
    %c0_i32_0 = arith.constant 0 : i32
    %c0_i32_1 = arith.constant 0 : i32
    return %c0_i32, %c0_i32_0 : i32, i32
  }
  func.func @transform_2(%arg0: i32) -> (i32, i32) {
    %c0_i32 = arith.constant 0 : i32
    %c0_i32_0 = arith.constant 0 : i32
    %c0_i32_1 = arith.constant 0 : i32
    return %c0_i32, %c0_i32_0 : i32, i32
  }
  func.func @transform_3(%arg0: i32) -> (i32, i32) {
    %c0_i32 = arith.constant 0 : i32
    %c0_i32_0 = arith.constant 0 : i32
    %c0_i32_1 = arith.constant 0 : i32
    return %c0_i32, %c0_i32_0 : i32, i32
  }
  func.func @transform_4(%arg0: i32) -> (i32, i32) {
    %c0_i32 = arith.constant 0 : i32
    %c0_i32_0 = arith.constant 0 : i32
    %c0_i32_1 = arith.constant 0 : i32
    return %c0_i32, %c0_i32_0 : i32, i32
  }
  func.func @transform_5(%arg0: i32) -> (i32, i32) {
    %c0_i32 = arith.constant 0 : i32
    %c0_i32_0 = arith.constant 0 : i32
    %c0_i32_1 = arith.constant 0 : i32
    return %c0_i32, %c0_i32_0 : i32, i32
  }
  func.func @transform_6(%arg0: i32) -> (i32, i32) {
    %c0_i32 = arith.constant 0 : i32
    %c0_i32_0 = arith.constant 0 : i32
    %c0_i32_1 = arith.constant 0 : i32
    return %c0_i32, %c0_i32_0 : i32, i32
  }
  func.func @transform_7(%arg0: i32) -> (i32, i32) {
    %c0_i32 = arith.constant 0 : i32
    %c0_i32_0 = arith.constant 0 : i32
    %c0_i32_1 = arith.constant 0 : i32
    return %c0_i32, %c0_i32_0 : i32, i32
  }
  func.func @transform_8(%arg0: i32) -> (i32, i32) {
    %c0_i32 = arith.constant 0 : i32
    %c0_i32_0 = arith.constant 0 : i32
    %c0_i32_1 = arith.constant 0 : i32
    return %c0_i32, %c0_i32_0 : i32, i32
  }
  func.func @transform_9(%arg0: i32) -> (i32, i32) {
    %c0_i32 = arith.constant 0 : i32
    %c0_i32_0 = arith.constant 0 : i32
    %c0_i32_1 = arith.constant 0 : i32
    return %c0_i32, %c0_i32_0 : i32, i32
  }
  func.func @transform_10(%arg0: i32) -> (i32, i32) {
    %c0_i32 = arith.constant 0 : i32
    %c0_i32_0 = arith.constant 0 : i32
    %c0_i32_1 = arith.constant 0 : i32
    return %c0_i32, %c0_i32_0 : i32, i32
  }
  func.func @transform_11(%arg0: i32) -> (i32, i32) {
    %c0_i32 = arith.constant 0 : i32
    %c0_i32_0 = arith.constant 0 : i32
    return %arg0, %c0_i32 : i32, i32
  }
}

</mosaic_0001>

<bundles_post_ra>
// kernel: tpu_custom_call.1
= control target key start
LH: loop header
LB: loop body
LE: loop exit
PB: predicated region body
PF: predicated region fallthrough
CT: control target
= control target key end

     0   :  { %16 = vsyncpa [#allocation3], 0  ;;  %s685_s0 = inlined_call_operand.vmem [shape: f32[8,16], index: 0, kind: input, shape index: {}]   ;;  %s686_s1 = inlined_call_operand.hbm [shape: f32[16,64], index: 1, kind: input, shape index: {}]   ;;  %s687_s2 = inlined_call_operand.hbm [shape: f32[1,64], index: 2, kind: input, shape index: {}]   ;;  %s688_s3 = inlined_call_operand.hbm [shape: f32[1,64], index: 3, kind: input, shape index: {}]   ;;  %s689_s4 = inlined_call_operand.hbm [shape: f32[1,64], index: 4, kind: input, shape index: {}]   ;;  %s690_s5 = inlined_call_operand.vmem [shape: f32[64,64], index: 5, kind: input, shape index: {}]   ;;  %s691_s6 = inlined_call_operand.hbm [shape: f32[1,64], index: 6, kind: input, shape index: {}]   ;;  %s692_s7 = inlined_call_operand.hbm [shape: f32[1,64], index: 7, kind: input, shape index: {}]   ;;  %s693_s8 = inlined_call_operand.hbm [shape: f32[1,64], index: 8, kind: input, shape index: {}]   ;;  %s694_s9 = inlined_call_operand.vmem [shape: f32[64,4], index: 9, kind: input, shape index: {}]   ;;  %s695_s10 = inlined_call_operand.vmem [shape: f32[1,4], index: 10, kind: input, shape index: {}]   ;;  %s696_s11 = inlined_call_operand.vmem [shape: f32[8,4], index: 11, kind: output, shape index: {}]  }
   0x1   :  { %17 = vsyncpa [#allocation5], 0 }
   0x2   :  { %18 = vsyncpa [#allocation8], 0  ;;  %s40_s19 = sshll.u32 %s687_s2, 4  ;;  %s41_s19 = int_to_ptr.hbm [resolvable:$true] %s40_s19 }
   0x3   :  { %19 = vsyncpa [#allocation11], 0  ;;  %s525_s20 = smov [#allocation4]   ;;  %s62_s24 = sshll.u32 %s689_s4, 4  ;;  %s63_s24 = int_to_ptr.hbm [resolvable:$true] %s62_s24 }
   0x4   :  { %s42_s21 = sshll.u32 %s525_s20, 4  ;;  %s526_s25 = smov [#allocation7]   ;;  %s43_s21 = int_to_ptr.vmem [resolvable:$true] %s42_s21 }
   0x5   :  { %45 = dma.hbm_to_vmem [thread:$0]  %s41_s19, 16, %s43_s21, [#allocation5]  }
   0x6   :  { %s64_s26 = sshll.u32 %s526_s25, 4  ;;  %s86_s29 = sshll.u32 %s692_s7, 4  ;;  %s65_s26 = int_to_ptr.vmem [resolvable:$true] %s64_s26  ;;  %s87_s29 = int_to_ptr.hbm [resolvable:$true] %s86_s29 }
   0x7   :  { %67 = dma.hbm_to_vmem [thread:$0]  %s63_s24, 16, %s65_s26, [#allocation8]  }
   0x8   :  { %s26_s12 = sshll.u32 %s686_s1, 4  ;;  %s527_s13 = smov [#allocation10]   ;;  %s27_s12 = int_to_ptr.hbm [resolvable:$true] %s26_s12 }
   0x9   :  { %s88_s14 = sshll.u32 %s527_s13, 4  ;;  %s528_s4 = smov [#allocation2]   ;;  %s89_s14 = int_to_ptr.vmem [resolvable:$true] %s88_s14 }
   0xa   :  { %91 = dma.hbm_to_vmem [thread:$0]  %s87_s29, 16, %s89_s14, [#allocation11]  }
   0xb   :  { %s28_s15 = sshll.u32 %s528_s4, 4  ;;  %s529_s16 = smov 128   ;;  %s29_s15 = int_to_ptr.vmem [resolvable:$true] %s28_s15 }
   0xc   :  { %s530_s17 = smov 8   ;;  %s51_s19 = sshll.u32 %s688_s3, 4  ;;  %s52_s19 = int_to_ptr.hbm [resolvable:$true] %s51_s19 }
   0xd   :  { %34 = dma.hbm_to_vmem [thread:$0]  %s27_s12, 256, %s29_s15, [#allocation3], %s529_s16, %s529_s16, %s530_s17  }
   0xe   :  { %s531_s20 = smov [#allocation6]   ;;  %s75_s23 = sshll.u32 %s691_s6, 4  ;;  %s76_s23 = int_to_ptr.hbm [resolvable:$true] %s75_s23 }
   0xf   :  { %s53_s21 = sshll.u32 %s531_s20, 4  ;;  %s532_s24 = smov [#allocation9]   ;;  %s54_s21 = int_to_ptr.vmem [resolvable:$true] %s53_s21 }
  0x10   :  { %56 = dma.hbm_to_vmem [thread:$0]  %s52_s19, 16, %s54_s21, [#allocation5]  }
  0x11   :  { %s77_s25 = sshll.u32 %s532_s24, 4  ;;  %s97_s28 = sshll.u32 %s693_s8, 4  ;;  %s78_s25 = int_to_ptr.vmem [resolvable:$true] %s77_s25  ;;  %s98_s28 = int_to_ptr.hbm [resolvable:$true] %s97_s28 }
  0x12   :  { %80 = dma.hbm_to_vmem [thread:$0]  %s76_s23, 16, %s78_s25, [#allocation8]  }
  0x13   :  { %s533_s3 = smov [#allocation12]  }
  0x14   :  { %s99_s29 = sshll.u32 %s533_s3, 4  ;;  %s100_s29 = int_to_ptr.vmem [resolvable:$true] %s99_s29 }
  0x15   :  { %102 = dma.hbm_to_vmem [thread:$0]  %s98_s28, 16, %s100_s29, [#allocation11]  }
  0x16   :  { %517 = dma.done.wait [#allocation3], 256  }
  0x17   :  { %518 = vsyncadd [#allocation3], 4294967040 }
  0x18   :  { %519 = dma.done.wait [#allocation5], 32  }
  0x19   :  { %520 = vsyncadd [#allocation5], 4294967264 }
  0x1a   :  { %521 = dma.done.wait [#allocation8], 32  }
  0x1b   :  { %522 = vsyncadd [#allocation8], 4294967264 }
  0x1c   :  { %523 = dma.done.wait [#allocation11], 32  }
  0x1d   :  { %524 = vsyncadd [#allocation11], 4294967264  ;;  %v137_v0 = vld [vmem:[#allocation2 + $0x8] sm:$0xff]  ;;  %v136_v1 = vld [vmem:[#allocation2] sm:$0xff]  ;;  %vm142_vm0 = vcmask 130048   ;;  %vm168_vm1 = vcmask 523264  }
  0x1e   :  { %160 = vmatpush.msra.mxu0 %v137_v0  ;;  %v135_v2 = vld [vmem:[%s685_s0] sm:$0xff]  ;;  %v334_v3 = vld [vmem:[#allocation4] ss:$0 sm:$0xff]  ;;  %v534_v7 = vmov 64.0   ;;  %v214_v19 = vld [vmem:[%s690_s5 + $0x38] sm:$0xff]  ;;  %vm311_vm9 = vcmask 31744  }
  0x1f   :  { %341 = vrcp.f32 %v534_v7  ;;  %230 = vmatpush.msra.mxu1 %v214_v19  ;;  %v213_v20 = vld [vmem:[%s690_s5 + $0x30] sm:$0xff]  ;;  %v212_v21 = vld [vmem:[%s690_s5 + $0x28] sm:$0xff]  ;;  %v211_v22 = vld [vmem:[%s690_s5 + $0x20] sm:$0xff] }
  0x20   :  { %161 = vmatpush.msra.mxu0 %v136_v1  ;;  %v210_v23 = vld [vmem:[%s690_s5 + $0x18] sm:$0xff]  ;;  %v209_v24 = vld [vmem:[%s690_s5 + $0x10] sm:$0xff]  ;;  %v208_v25 = vld [vmem:[%s690_s5 + $0x8] sm:$0xff] }
  0x21   :  { %321 = vmatmul.msk.f32.vlgmr.msra.gmra.mxu0 %vm142_vm0, %v135_v2  ;;  %231 = vmatpush.msra.mxu1 %v213_v20  ;;  %v207_v26 = vld [vmem:[%s690_s5] sm:$0xff]  ;;  %v335_v36 = vld [vmem:[#allocation6] ss:$0 sm:$0xff]  ;;  %v336_v39 = vld [vmem:[#allocation7] ss:$0 sm:$0xff] }
  0x22   :  { %v337_v43 = vld [vmem:[#allocation9] ss:$0 sm:$0xff]  ;;  %v282_v52 = vld [vmem:[%s694_s9 + $0x38] sm:$0xff]  ;;  %v280_v54 = vld [vmem:[%s694_s9 + $0x28] sm:$0xff] }
  0x23   :  { %232 = vmatpush.msra.mxu1 %v212_v21  ;;  %298 = vmatpush.msra.mxu2 %v282_v52  ;;  %v281_v53 = vld [vmem:[%s694_s9 + $0x30] sm:$0xff]  ;;  %v279_v55 = vld [vmem:[%s694_s9 + $0x20] sm:$0xff]  ;;  %v278_v56 = vld [vmem:[%s694_s9 + $0x18] sm:$0xff] }
  0x24   :  { %v277_v57 = vld [vmem:[%s694_s9 + $0x10] sm:$0xff]  ;;  %v276_v58 = vld [vmem:[%s694_s9 + $0x8] sm:$0xff]  ;;  %v275_v59 = vld [vmem:[%s694_s9] sm:$0xff] }
  0x25   :  { %v342_v8 = vpop.eup %341  ;;  %233 = vmatpush.msra.mxu1 %v211_v22  ;;  %299 = vmatpush.msra.mxu2 %v281_v53 }
  0x26   :  { %v173_v9 = vmul.f32 64.0, %v342_v8  ;;  %vm177_vm2 = vweird.f32 %v342_v8 }
  0x27   :  { %234 = vmatpush.msra.mxu1 %v210_v23  ;;  %300 = vmatpush.msra.mxu2 %v280_v54 }
  0x28   :  { %v174_v10 = vsub.f32 1.0, %v173_v9 }
  0x29   :  { %235 = vmatpush.msra.mxu1 %v209_v24  ;;  %301 = vmatpush.msra.mxu2 %v279_v55 }
  0x2a   :  { %v175_v11 = vmul.f32 %v342_v8, %v174_v10 }
  0x2b   :  { %236 = vmatpush.msra.mxu1 %v208_v25  ;;  %302 = vmatpush.msra.mxu2 %v278_v56 }
  0x2c   :  { %v176_v12 = vadd.f32 %v342_v8, %v175_v11 }
  0x2d   :  { %237 = vmatpush.msra.mxu1 %v207_v26  ;;  %303 = vmatpush.msra.mxu2 %v277_v57 }
  0x2e   :  { %v620_v13 = vsel %vm177_vm2, %v342_v8, %v176_v12  ;;  %v339_v8 = vld [vmem:[#allocation12] ss:$0 sm:$0xff]  ;;  %v340_v12 = vld [vmem:[%s695_s10] ss:$0 sm:$0xff] }
  0x2f   :  { %304 = vmatpush.msra.mxu2 %v276_v58 }
  0x31   :  { %305 = vmatpush.msra.mxu2 %v275_v59 }
  0x9e   :  { %v163_v4 = vpop.f32.mrf.mxu0 }
  0x9f   :  { %v164_v5 = vadd.f32 %v334_v3, %v163_v4 }
  0xa1   :  { %v169_v6 = vsel %vm168_vm1, %v164_v5, 0.0 }
  0xa2   :  { %170 = vadd.xlane.f32.xlu0 %v169_v6 }
 0x115   :  { %v171_v14 = vpop.xlane.xlu0 %170 }
 0x116   :  { %v179_v15 = vmul.f32 %v620_v13, %v171_v14 }
 0x118   :  { %v180_v16 = vsub.f32 %v164_v5, %v179_v15  ;;  %v338_v5 = vld [vmem:[#allocation10] ss:$0 sm:$0xff] }
 0x11a   :  { %v181_v17 = vmul.f32 %v180_v16, %v180_v16 }
 0x11c   :  { %v182_v18 = vsel %vm168_vm1, %v181_v17, 0.0 }
 0x11d   :  { %183 = vadd.xlane.f32.xlu0 %v182_v18 }
 0x190   :  { %v184_v27 = vpop.xlane.xlu0 %183 }
 0x191   :  { %v185_v28 = vmul.f32 %v184_v27, %v620_v13 }
 0x193   :  { %v186_v29 = vadd.f32 1e-05, %v185_v28 }
 0x195   :  { %343 = vrsqrt.f32 %v186_v29  ;;  %vm193_vm4 = vweird.f32 %v186_v29 }
 0x19b   :  { %v344_v30 = vpop.eup %343 }
 0x19c   :  { %v188_v31 = vmul.f32 %v344_v30, %v186_v29  ;;  %vm194_vm3 = vweird.f32 %v344_v30 }
 0x19d   :  { %vm195_vm5 = vmor %vm193_vm4, %vm194_vm3 }
 0x19e   :  { %v189_v32 = vmul.f32 %v344_v30, %v188_v31 }
 0x1a0   :  { %v190_v33 = vmul.f32 0.5, %v189_v32 }
 0x1a2   :  { %v191_v34 = vsub.f32 1.5, %v190_v33 }
 0x1a4   :  { %v192_v35 = vmul.f32 %v344_v30, %v191_v34 }
 0x1a6   :  { %v196_v37 = vsel %vm195_vm5, %v344_v30, %v192_v35 }
 0x1a7   :  { %v197_v38 = vmul.f32 %v196_v37, %v180_v16 }
 0x1a9   :  { %v201_v40 = vmul.f32 %v335_v36, %v197_v38 }
 0x1ab   :  { %v205_v41 = vadd.f32 %v336_v39, %v201_v40 }
 0x1ad   :  { %v206_v42 = vmax.f32 %v205_v41, 0.0 }
 0x1af   :  { %322 = vmatmul.msk.f32.vlgmr.msra.gmra.mxu1 %vm168_vm1, %v206_v42 }
 0x22c   :  { %v239_v44 = vpop.f32.mrf.mxu1 }
 0x22d   :  { %v240_v45 = vadd.f32 %v337_v43, %v239_v44 }
 0x22f   :  { %v244_v46 = vsel %vm168_vm1, %v240_v45, 0.0 }
 0x230   :  { %245 = vadd.xlane.f32.xlu1 %v244_v46 }
 0x2a3   :  { %v246_v47 = vpop.xlane.xlu1 %245 }
 0x2a4   :  { %v247_v48 = vmul.f32 %v246_v47, %v620_v13 }
 0x2a6   :  { %v248_v49 = vsub.f32 %v240_v45, %v247_v48 }
 0x2a8   :  { %v249_v50 = vmul.f32 %v248_v49, %v248_v49 }
 0x2aa   :  { %v250_v51 = vsel %vm168_vm1, %v249_v50, 0.0 }
 0x2ab   :  { %251 = vadd.xlane.f32.xlu1 %v250_v51 }
 0x31e   :  { %v252_v60 = vpop.xlane.xlu1 %251 }
 0x31f   :  { %v253_v61 = vmul.f32 %v252_v60, %v620_v13 }
 0x321   :  { %v254_v62 = vadd.f32 1e-05, %v253_v61 }
 0x323   :  { %345 = vrsqrt.f32 %v254_v62  ;;  %vm261_vm7 = vweird.f32 %v254_v62 }
 0x329   :  { %v346_v63 = vpop.eup %345 }
 0x32a   :  { %v256_v0 = vmul.f32 %v346_v63, %v254_v62  ;;  %vm262_vm6 = vweird.f32 %v346_v63 }
 0x32b   :  { %vm263_vm8 = vmor %vm261_vm7, %vm262_vm6 }
 0x32c   :  { %v257_v1 = vmul.f32 %v346_v63, %v256_v0 }
 0x32e   :  { %v258_v2 = vmul.f32 0.5, %v257_v1 }
 0x330   :  { %v259_v3 = vsub.f32 1.5, %v258_v2 }
 0x332   :  { %v260_v4 = vmul.f32 %v346_v63, %v259_v3 }
 0x334   :  { %v264_v6 = vsel %vm263_vm8, %v346_v63, %v260_v4 }
 0x335   :  { %v265_v7 = vmul.f32 %v264_v6, %v248_v49 }
 0x337   :  { %v269_v9 = vmul.f32 %v338_v5, %v265_v7 }
 0x339   :  { %v273_v10 = vadd.f32 %v339_v8, %v269_v9 }
 0x33b   :  { %v274_v11 = vmax.f32 %v273_v10, 0.0 }
 0x33d   :  { %323 = vmatmul.msk.f32.vlgmr.msra.gmra.mxu2 %vm168_vm1, %v274_v11 }
 0x3c0   :  { %v307_v13 = vpop.f32.mrf.mxu2 }
 0x3c1   :  { %v308_v14 = vadd.f32 %v340_v12, %v307_v13 }
 0x3c3   :  { %347 = vtanh.f32 %v308_v14 }
 0x3c9   :  { %v348_v15 = vpop.eup %347 }
 0x3ca   :  { %312 = vst.msk [vmem:[%s696_s11] sm:$0xff] %vm311_vm9, %v348_v15 }
 0x3cb   :  { %317 = vsyncpa [#allocation3], 1 }
 0x3cc   :  { %318 = vsyncpa [#allocation5], 1 }
 0x3cd   :  { %319 = vsyncpa [#allocation8], 1 }
 0x3ce   :  { %320 = vsyncpa [#allocation11], 1 }

</bundles_post_ra>
